<compile_context>
chip_gen: v5e
topology: v5e:2x2
jax: 0.10.0
libtpu: 0.0.40
codegen_flags: <defaults>
</compile_context>

<pallas_src>
import functools

import jax
import jax.numpy as jnp
from jax.experimental import pallas as pl
from jax.experimental.pallas import tpu as pltpu

# ----------------------------- configuration --------------------------------
B_IN = 8            # batch (hard-coded by reshape(8, ...) in the torch forward)
C_IN = 1            # input channels
H_IN = 8            # input height (kernel height of the multi-scale convs)
W_IN = 1024         # input width (original uses 10240)
OC_MS = 32          # multi-scale conv output channels (layer_end needs 32)
C_ATT = 128         # attention channel count (hard-coded in the module)
RATION = 1          # required so that .view(batch, channel, H, W) is valid

W_FEAT = (W_IN - 16) // 16 + 1        # 64
W_POOL = W_FEAT // 2                  # 32
W_ATT = (W_POOL - 16) // 3 + 1        # 6
H_ATT = 1
CW = C_ATT * W_ATT                    # 768  (torch NCHW flattening of one map)
NW = B_IN * W_ATT                     # 48   (rows of the lane-dense WC layout)


def _full_spec(shape):
    """Whole-array block (grid=(1,))."""
    return pl.BlockSpec(shape, lambda i: (0,) * len(shape))


# ----------------------------- Pallas kernels --------------------------------


def _mm_kernel(a_ref, b_ref, o_ref, *, relu):
    acc = jnp.dot(a_ref[...], b_ref[...], preferred_element_type=jnp.float32)
    if relu:
        acc = jnp.maximum(acc, 0.0)
    o_ref[...] = acc


def _mm_bias_kernel(a_ref, b_ref, bias_ref, o_ref, *, relu):
    acc = jnp.dot(a_ref[...], b_ref[...], preferred_element_type=jnp.float32) + bias_ref[...]
    if relu:
        acc = jnp.maximum(acc, 0.0)
    o_ref[...] = acc


def pallas_matmul(a, b, bias=None, relu=False, block_m=None):
    """out = relu?(a @ b [+ bias]); a:(M,K), b:(K,N), bias:(N,) or (1,N)."""
    a = a.astype(jnp.float32)
    b = b.astype(jnp.float32)
    M, K = a.shape
    K2, N = b.shape
    assert K == K2
    if block_m is None or M % block_m != 0:
        block_m = M
    grid = (M // block_m,)
    in_specs = [pl.BlockSpec((block_m, K), lambda i: (i, 0)),
                pl.BlockSpec((K, N), lambda i: (0, 0))]
    args = [a, b]
    if bias is not None:
        in_specs.append(pl.BlockSpec((1, N), lambda i: (0, 0)))
        args.append(bias.reshape(1, N).astype(jnp.float32))
        kernel = functools.partial(_mm_bias_kernel, relu=relu)
    else:
        kernel = functools.partial(_mm_kernel, relu=relu)
    return pl.pallas_call(
        kernel,
        grid=grid,
        in_specs=in_specs,
        out_specs=pl.BlockSpec((block_m, N), lambda i: (i, 0)),
        out_shape=jax.ShapeDtypeStruct((M, N), jnp.float32),
        compiler_params=pltpu.CompilerParams(dimension_semantics=("parallel",)),
    )(*args)


def _mlp2_kernel(a_ref, w1_ref, b1_ref, w2_ref, b2_ref, o_ref):
    z = jnp.dot(a_ref[...], w1_ref[...], preferred_element_type=jnp.float32) + b1_ref[...]
    z = jnp.maximum(z, 0.0)
    y = jnp.dot(z, w2_ref[...], preferred_element_type=jnp.float32) + b2_ref[...]
    o_ref[...] = jnp.maximum(y, 0.0)


def pallas_mlp2(a, w1, b1, w2, b2):
    """relu(relu(a@w1+b1)@w2+b2) with the intermediate kept in VMEM (layer_end)."""
    a = a.astype(jnp.float32)
    M, K = a.shape
    H = w1.shape[1]
    N = w2.shape[1]
    return pl.pallas_call(
        _mlp2_kernel,
        grid=(1,),
        in_specs=[_full_spec((M, K)), _full_spec((K, H)), _full_spec((1, H)),
                  _full_spec((H, N)), _full_spec((1, N))],
        out_specs=_full_spec((M, N)),
        out_shape=jax.ShapeDtypeStruct((M, N), jnp.float32),
        compiler_params=pltpu.CompilerParams(dimension_semantics=("arbitrary",)),
    )(a, w1.astype(jnp.float32), b1.reshape(1, H).astype(jnp.float32),
      w2.astype(jnp.float32), b2.reshape(1, N).astype(jnp.float32))


def _bmm_kernel(a_ref, b_ref, o_ref):
    for g in range(a_ref.shape[0]):          # small static batch -> unrolled 2-D dots
        o_ref[g] = jnp.dot(a_ref[g], b_ref[g], preferred_element_type=jnp.float32)


def pallas_bmm(a, b):
    """Batched matmul (whole batch in one block): (G,M,K)@(G,K,N)->(G,M,N)."""
    a = a.astype(jnp.float32)
    b = b.astype(jnp.float32)
    G, M, K = a.shape
    N = b.shape[2]
    return pl.pallas_call(
        _bmm_kernel,
        grid=(1,),
        in_specs=[_full_spec((G, M, K)), _full_spec((G, K, N))],
        out_specs=_full_spec((G, M, N)),
        out_shape=jax.ShapeDtypeStruct((G, M, N), jnp.float32),
        compiler_params=pltpu.CompilerParams(dimension_semantics=("arbitrary",)),
    )(a, b)


def _portrait_attn_kernel(q_ref, k_ref, v_ref, at_ref, o_ref):
    # q,k,v: (NB, W, 128) with rows = torch `.view(batch, Width, -1)` chunks.
    q = q_ref[...]
    k = k_ref[...]
    v = v_ref[...]
    # st[b, key, query] = scores[b, query, key]  -> torch Softmax(dim=1) becomes a
    # lane-axis softmax here (lane-dense reduction).
    st = jnp.einsum("bik,bjk->bij", k, q, preferred_element_type=jnp.float32)
    st = st - jnp.max(st, axis=-1, keepdims=True)
    e = jnp.exp(st)
    at = e / jnp.sum(e, axis=-1, keepdims=True)          # == softmax(scores, dim=1)^T
    at_ref[...] = at
    # out_wc[b, key, c] = sum_query A[b, query, key] * V[b, query, c]
    o_ref[...] = jnp.einsum("bij,bjk->bik", at, v, preferred_element_type=jnp.float32)


def pallas_portrait_attention(q, k, v):
    """All portrait attentions (SC, MS and the path-1 fused one) in one call."""
    q = q.astype(jnp.float32)
    k = k.astype(jnp.float32)
    v = v.astype(jnp.float32)
    NB, T, D = q.shape
    return pl.pallas_call(
        _portrait_attn_kernel,
        grid=(1,),
        in_specs=[_full_spec((NB, T, D))] * 3,
        out_specs=(_full_spec((NB, T, T)), _full_spec((NB, T, D))),
        out_shape=(jax.ShapeDtypeStruct((NB, T, T), jnp.float32),
                   jax.ShapeDtypeStruct((NB, T, D), jnp.float32)),
        compiler_params=pltpu.CompilerParams(dimension_semantics=("arbitrary",)),
    )(q, k, v)


def _channel_softmax(z):
    z = z - jnp.max(z, axis=-1, keepdims=True)
    e = jnp.exp(z)
    return e / jnp.sum(e, axis=-1, keepdims=True)


def _tail_kernel(idc_ref, a1_ref, a2_ref, a3_ref, w57_ref, w4_ref, w6_ref, w8_ref,
                 o1_ref, o2_ref, o3_ref):
    # fusion5 and fusion7 share the same input -> one Cout=256 matmul, then split.
    ident = jnp.dot(idc_ref[...], w57_ref[...], preferred_element_type=jnp.float32)
    ident = jnp.maximum(ident, 0.0)                      # (48,256)
    att1 = _channel_softmax(jnp.dot(a1_ref[...], w4_ref[...], preferred_element_type=jnp.float32))
    att2 = _channel_softmax(jnp.dot(a2_ref[...], w6_ref[...], preferred_element_type=jnp.float32))
    att3 = _channel_softmax(jnp.dot(a3_ref[...], w8_ref[...], preferred_element_type=jnp.float32))
    o1_ref[...] = ident[:, :C_ATT] * att1                # out_method1
    o2_ref[...] = ident[:, C_ATT:] * att2                # out_method2
    o3_ref[...] = ident[:, C_ATT:] * att3                # out_method3


def pallas_tail(idc, a1c, a2c, a3c, w57, w4, w6, w8):
    args = [a.astype(jnp.float32) for a in (idc, a1c, a2c, a3c, w57, w4, w6, w8)]
    out = jax.ShapeDtypeStruct((NW, C_ATT), jnp.float32)
    return pl.pallas_call(
        _tail_kernel,
        grid=(1,),
        in_specs=[_full_spec(a.shape) for a in args],
        out_specs=(_full_spec((NW, C_ATT)),) * 3,
        out_shape=(out,) * 3,
        compiler_params=pltpu.CompilerParams(dimension_semantics=("arbitrary",)),
    )(*args)


# ----------------------- layout / im2col glue (tiny XLA ops) ------------------


def wc_to_cw(m):
    """(B*W, C) lane-dense layout -> (B, C*W) torch NCHW flattening."""
    return jnp.transpose(m.reshape(B_IN, W_ATT, C_ATT), (0, 2, 1)).reshape(B_IN, CW)


def cw_to_wc(v):
    return jnp.transpose(v.reshape(B_IN, C_ATT, W_ATT), (0, 2, 1)).reshape(NW, C_ATT)


def wc_to_r6(m):
    """torch `.view(batch, Width, -1)` of the NCHW tensor, starting from WC layout."""
    return wc_to_cw(m).reshape(B_IN, W_ATT, C_ATT)


def wc_to_nchw(m):
    return jnp.transpose(m.reshape(B_IN, W_ATT, C_ATT), (0, 2, 1)).reshape(
        B_IN, C_ATT, H_ATT, W_ATT)


def im2col_w3(x):
    """k=3 / pad=1 window gather along W; x: (B*W, C) or (B, W, C) -> (B*W, 3*C)."""
    C = x.shape[-1]
    x3 = x.reshape(B_IN, W_ATT, C)
    xp = jnp.pad(x3, ((0, 0), (1, 1), (0, 0)))
    cols = [xp[:, k:k + W_ATT, :] for k in range(3)]
    return jnp.concatenate(cols, axis=-1).reshape(NW, 3 * C)


def w_conv3_flat(w):
    """(Cout,Cin,3,3) conv weight -> (3*Cin,Cout); on H=1 inputs only kh==1 is nonzero."""
    return jnp.transpose(w[:, :, 1, :], (2, 1, 0)).reshape(-1, w.shape[0])


def w_conv1d3_flat(w):
    """(Cout,Cin,3) Conv1d weight -> (3*Cin,Cout)."""
    return jnp.transpose(w, (2, 1, 0)).reshape(-1, w.shape[0])


def conv1d_pair(a_cw, b_cw, w):
    """Conv1d(2->1, k=3, p=1, bias=False) over the flattened C*W axis (layer_fusion2x)."""
    L = a_cw.shape[1]
    ap = jnp.pad(a_cw, ((0, 0), (1, 1)))
    bp = jnp.pad(b_cw, ((0, 0), (1, 1)))
    out = jnp.zeros_like(a_cw)
    for k in range(3):
        out = out + w[0, 0, k] * ap[:, k:k + L] + w[0, 1, k] * bp[:, k:k + L]
    return out


def build_ms_patches(x):
    """Shared im2col for the four multi-scale convs (widest window KW=128, stride 16)."""
    x2 = x[:, 0]                                          # (B, 8, 1024)
    xp = jnp.pad(x2, ((0, 0), (0, 0), (56, 56)))          # (B, 8, 1136)
    xr = xp.reshape(B_IN, H_IN, (W_IN + 112) // 16, 16)   # (B, 8, 71, 16)
    parts = [xr[:, :, t:t + W_FEAT, :] for t in range(8)]
    pat = jnp.stack(parts, axis=3)                        # (B, kh, o, t, r)
    pat = jnp.transpose(pat, (0, 2, 1, 3, 4))             # (B, o, kh, t, r)
    return pat.reshape(B_IN * W_FEAT, H_IN * 128)         # (512, 1024)


def build_ms_weight(p):
    """Fold features1..4 (placed at their window offsets) + the 1x1 layer0 into one weight."""
    w0 = p["layer0_w"].reshape(OC_MS, OC_MS)
    b0 = p["layer0_b"]
    rows, biases = [], []
    for name, kw, pad in (("feat1", 16, 0), ("feat2", 32, 8),
                          ("feat3", 64, 24), ("feat4", 128, 56)):
        off = 56 - pad
        w = p[name + "_w"][:, 0]                                          # (32, 8, KW)
        wb = jnp.zeros((OC_MS, H_IN, 128), jnp.float32).at[:, :, off:off + kw].set(w)
        rows.append(w0 @ wb.reshape(OC_MS, H_IN * 128))                   # (32, 1024)
        biases.append(w0 @ p[name + "_b"] + b0)
    return jnp.concatenate(rows, axis=0).T, jnp.concatenate(biases, axis=0).reshape(1, -1)


def build_end_patches(out_multi_mat):
    """MaxPool2d(2,2) + im2col for the (2,16) stride-3 conv of layer_end."""
    om = out_multi_mat.reshape(B_IN, W_POOL, 2, 2, 2, OC_MS)   # b, sw, wr, sh, sr, c
    pool = jnp.max(om, axis=(2, 4))                            # (B, 32, 2, 32) b, sw, sh, c
    parts = [pool[:, kw:kw + 16:3, :, :] for kw in range(16)]  # each (B, 6, 2, 32)
    pat = jnp.stack(parts, axis=2)                             # (B, wo, kw, kh, c)
    return pat.reshape(B_IN * W_ATT, 16 * 2 * OC_MS)           # (48, 1024)


def build_qkv_weight(p):
    """Concatenate the six 1x1 Q/K/V convs of both axis blocks into one (128,768) weight."""
    mats = [p["Qh_w"], p["Kh_w"], p["Vh_w"], p["Qw_w"], p["Kw_w"], p["Vw_w"]]
    W = jnp.concatenate([m.reshape(C_ATT, C_ATT).T for m in mats], axis=1)
    z = jnp.zeros((C_ATT,), jnp.float32)                       # horizontal convs have no bias
    b = jnp.concatenate([z, z, z, p["Qw_b"], p["Kw_b"], p["Vw_b"]]).reshape(1, -1)
    return W, b


# ------------------------------ full forward ----------------------------------


def attention_fusion_forward(x, p):
    # ---- SC-AE front end ----------------------------------------------------
    # TODO(synk): the pretrained SC-AE model is an external constructor argument
    # (not defined in this file); substituted by a deterministic pooled linear
    # projection producing the same (B, 128, 1, 6) feature-map shape.
    pooled = x[:, 0].mean(axis=1).reshape(B_IN, 64, W_IN // 64).mean(axis=-1)     # (8,64)
    sc_cw = pallas_matmul(pooled, p["ae_w"], bias=p["ae_b"], relu=True)           # (8,768)
    sc_wc = cw_to_wc(sc_cw)                                                       # (48,128)

    # ---- Multi_features (4 convs + layer0 folded into one matmul) -----------
    Wms, bms = build_ms_weight(p)
    out_multi_mat = pallas_matmul(build_ms_patches(x), Wms, bias=bms,
                                  relu=True, block_m=256)                         # (512,128)
    w1f = jnp.transpose(p["end1_w"], (3, 2, 1, 0)).reshape(16 * 2 * OC_MS, 64)
    w2f = p["end2_w"].reshape(C_ATT, 64).T
    ms_wc = pallas_mlp2(build_end_patches(out_multi_mat), w1f, p["end1_b"],
                        w2f, p["end2_b"])                                         # (48,128)

    # ---- fused Q/K/V (both axis blocks x both feature maps, one matmul) ------
    Wqkv, bqkv = build_qkv_weight(p)
    X2 = jnp.concatenate([sc_wc, ms_wc], axis=0)                                  # (96,128)
    QKV = pallas_matmul(X2, Wqkv, bias=bqkv, relu=True)                           # (96,768)

    def col(lo, hi):
        return QKV[:NW, lo:hi], QKV[NW:, lo:hi]

    # Horizontal Q/K (cols 0:256) are computed but, with H==1, their only consumer
    # is a softmax over a singleton axis (identically 1) -> no effect on outputs.
    vh_SC, vh_MS = col(256, 384)
    qw_SC, qw_MS = col(384, 512)
    kw_SC, kw_MS = col(512, 640)
    vw_SC, vw_MS = col(640, 768)

    # Horizontal per-source output: softmax((1x1)) == 1 -> out_h = V_h * gamma_h.
    outh_SC_wc = p["gamma_h"] * vh_SC

    # Portrait `.view(batch, Width, -1)` chunks (torch's raw reshape of NCHW data).
    Qr_SC, Qr_MS = wc_to_r6(qw_SC), wc_to_r6(qw_MS)
    Kr_SC, Kr_MS = wc_to_r6(kw_SC), wc_to_r6(kw_MS)
    Vr_SC, Vr_MS = wc_to_r6(vw_SC), wc_to_r6(vw_MS)

    # ---- path-1: fuse Q/K/V across sources (fusion31/32/33) as one batched matmul
    Qcat = jnp.concatenate([Qr_SC, Qr_MS], axis=-1)                               # (8,6,256)
    Kcat = jnp.concatenate([Kr_SC, Kr_MS], axis=-1)
    Vcat = jnp.concatenate([Vr_SC, Vr_MS], axis=-1)
    A3 = jnp.stack([im2col_w3(Qcat), im2col_w3(Kcat), im2col_w3(Vcat)], axis=0)   # (3,48,768)
    W3 = jnp.stack([w_conv1d3_flat(p["fusion31_w"]),
                    w_conv1d3_flat(p["fusion32_w"]),
                    w_conv1d3_flat(p["fusion33_w"])], axis=0)                     # (3,768,128)
    F = pallas_bmm(A3, W3)                                                        # (3,48,128)
    QF3 = F[0].reshape(B_IN, W_ATT, C_ATT)
    KF3 = F[1].reshape(B_IN, W_ATT, C_ATT)
    VF3 = F[2].reshape(B_IN, W_ATT, C_ATT)

    # ---- all portrait attentions (SC, MS, fused) in ONE whole-batch kernel ----
    Q_all = jnp.concatenate([Qr_SC, Qr_MS, QF3], axis=0)                          # (24,6,128)
    K_all = jnp.concatenate([Kr_SC, Kr_MS, KF3], axis=0)
    V_all = jnp.concatenate([Vr_SC, Vr_MS, VF3], axis=0)
    At_all, Out_all = pallas_portrait_attention(Q_all, K_all, V_all)

    outw_SC_wc = p["gamma_w"] * Out_all[0:8].reshape(NW, C_ATT)
    outw_MS_wc = p["gamma_w"] * Out_all[8:16].reshape(NW, C_ATT)
    amw1_wc = p["gamma_w1"] * Out_all[16:24].reshape(NW, C_ATT)

    # ---- path-1 horizontal fusion: only the V pair (fusion23) affects outputs ----
    # (fusion21/22 feed a softmax over the singleton H axis == 1, so they are skipped)
    vhf_cw = conv1d_pair(wc_to_cw(vh_SC), wc_to_cw(vh_MS), p["fusion23_w"])       # (8,768)
    vhf_wc = cw_to_wc(vhf_cw)                                                     # (48,128)
    amh1_wc = p["gamma_h1"] * vhf_wc

    # ---- path-2 ----------------------------------------------------------------
    A_w_SC = jnp.transpose(At_all[0:8], (0, 2, 1)).reshape(B_IN, W_ATT * W_ATT)
    A_w_MS = jnp.transpose(At_all[8:16], (0, 2, 1)).reshape(B_IN, W_ATT * W_ATT)
    L = jnp.concatenate([A_w_SC, A_w_MS], axis=1)                                 # (8,72)
    A_w2 = pallas_matmul(L, p["line2_w"].T, bias=p["line2_b"]).reshape(B_IN, W_ATT, W_ATT)
    amw2_wc = p["gamma_w2"] * pallas_bmm(jnp.transpose(A_w2, (0, 2, 1)),
                                         VF3).reshape(NW, C_ATT)
    # line1 on the concatenation of two degenerate (1x1, == 1.0) horizontal maps:
    s_line1 = p["line1_w"][0, 0] + p["line1_w"][0, 1] + p["line1_b"][0]
    amh2_wc = (p["gamma_h2"] * s_line1) * vhf_wc

    # ---- fused tail: fusion4/5/6/7/8 + channel softmaxes + gating --------------
    idc = im2col_w3(jnp.concatenate([sc_wc, ms_wc], axis=-1))                     # identity1
    a1c = im2col_w3(jnp.concatenate([amw1_wc, amh1_wc], axis=-1))
    a2c = im2col_w3(jnp.concatenate([amw2_wc, amh2_wc], axis=-1))
    # NOTE: the original torch forward concatenates out_w_SC twice and never uses
    # out_h_MS -- reproduced verbatim.
    a3c = im2col_w3(jnp.concatenate([outh_SC_wc, outw_SC_wc, outw_SC_wc, outw_MS_wc],
                                    axis=-1))
    w57 = jnp.concatenate([w_conv3_flat(p["fusion5_w"]), w_conv3_flat(p["fusion7_w"])],
                          axis=1)                                                 # (768,256)
    out1_wc, out2_wc, out3_wc = pallas_tail(
        idc, a1c, a2c, a3c, w57,
        w_conv3_flat(p["fusion4_w"]), w_conv3_flat(p["fusion6_w"]),
        w_conv3_flat(p["fusion8_w"]))

    return wc_to_nchw(out1_wc), wc_to_nchw(out2_wc), wc_to_nchw(out3_wc)


# ------------------------------- parameters -----------------------------------


def init_params(key):
    keys = iter(jax.random.split(key, 64))

    def w(shape, scale=0.05):
        return (scale * jax.random.normal(next(keys), shape)).astype(jnp.float32)

    p = {}
    # synthetic SC-AE projection (stand-in for the external pretrained model)
    p["ae_w"] = w((64, C_ATT * H_ATT * W_ATT))
    p["ae_b"] = w((1, C_ATT * H_ATT * W_ATT))
    # Multi_features
    p["feat1_w"] = w((OC_MS, C_IN, 8, 16));   p["feat1_b"] = w((OC_MS,))
    p["feat2_w"] = w((OC_MS, C_IN, 8, 32));   p["feat2_b"] = w((OC_MS,))
    p["feat3_w"] = w((OC_MS, C_IN, 8, 64));   p["feat3_b"] = w((OC_MS,))
    p["feat4_w"] = w((OC_MS, C_IN, 8, 128));  p["feat4_b"] = w((OC_MS,))
    p["layer0_w"] = w((OC_MS, OC_MS, 1, 1));  p["layer0_b"] = w((OC_MS,))
    p["end1_w"] = w((64, 32, 2, 16));         p["end1_b"] = w((64,))
    p["end2_w"] = w((128, 64, 1, 1));         p["end2_b"] = w((128,))
    # Axis_Horizontal_Attention_block(128, ration=1)  (bias=False)
    p["Qh_w"] = w((C_ATT // RATION, C_ATT, 1, 1))
    p["Kh_w"] = w((C_ATT // RATION, C_ATT, 1, 1))
    p["Vh_w"] = w((C_ATT // RATION, C_ATT, 1, 1))
    # Axis_Portrait_Attention_block(128, ration=1)    (bias=True)
    p["Qw_w"] = w((C_ATT // RATION, C_ATT, 1, 1));  p["Qw_b"] = w((C_ATT // RATION,))
    p["Kw_w"] = w((C_ATT // RATION, C_ATT, 1, 1));  p["Kw_b"] = w((C_ATT // RATION,))
    p["Vw_w"] = w((C_ATT // RATION, C_ATT, 1, 1));  p["Vw_b"] = w((C_ATT // RATION,))
    # fusion convs (conv2d3X3 -> Conv1d(k=3, pad=1, bias=False))
    p["fusion21_w"] = w((1, 2, 3))   # unused: consumer is a softmax over the singleton H axis
    p["fusion22_w"] = w((1, 2, 3))   # unused: same reason
    p["fusion23_w"] = w((1, 2, 3))
    p["fusion31_w"] = w((128, 256, 3))
    p["fusion32_w"] = w((128, 256, 3))
    p["fusion33_w"] = w((128, 256, 3))
    p["fusion4_w"] = w((128, 256, 3, 3))
    p["fusion5_w"] = w((128, 256, 3, 3))
    p["fusion6_w"] = w((128, 256, 3, 3))
    p["fusion7_w"] = w((128, 256, 3, 3))
    p["fusion8_w"] = w((128, 512, 3, 3))
    # linears (layer_line2 sized for the scaled-down W_ATT; original hard-codes 102)
    p["line1_w"] = w((1, 2));                              p["line1_b"] = w((1,))
    p["line2_w"] = w((W_ATT * W_ATT, 2 * W_ATT * W_ATT));  p["line2_b"] = w((W_ATT * W_ATT,))
    # gammas (torch inits these to 0; small nonzero constants so every path is exercised)
    p["gamma_h"] = jnp.full((1,), 0.5, jnp.float32)
    p["gamma_w"] = jnp.full((1,), 0.7, jnp.float32)
    p["gamma_h1"] = jnp.full((1,), 0.3, jnp.float32)
    p["gamma_w1"] = jnp.full((1,), 0.9, jnp.float32)
    p["gamma_h2"] = jnp.full((1,), 0.4, jnp.float32)
    p["gamma_w2"] = jnp.full((1,), 0.6, jnp.float32)
    # NOTE: layer_fusion1 (32->16, 3x3) is defined in __init__ but never used in forward.
    return p


# ---------------------------------- main ---------------------------------------

if __name__ == "__main__":
    kx, kp = jax.random.split(jax.random.PRNGKey(0))
    params = init_params(kp)
    x = jax.random.normal(kx, (B_IN, C_IN, H_IN, W_IN), dtype=jnp.float32)

    fwd = jax.jit(attention_fusion_forward)
    out1, out2, out3 = fwd(x, params)
    jax.block_until_ready((out1, out2, out3))

    expected = (B_IN, C_ATT, H_ATT, W_ATT)
    assert out1.shape == expected and out2.shape == expected and out3.shape == expected
    assert bool(jnp.all(jnp.isfinite(out1)))
    assert bool(jnp.all(jnp.isfinite(out2)))
    assert bool(jnp.all(jnp.isfinite(out3)))
    print("KERNEL_OK")
</pallas_src>

<mosaic_0001>
module attributes {stable_mosaic.version = 11 : i64} {
  func.func @_mm_bias_kernel(%arg0: i32, %arg1: memref<256x1024xf32, #tpu.memory_space<vmem>>, %arg2: memref<1024x128xf32, #tpu.memory_space<vmem>>, %arg3: memref<1x128xf32, #tpu.memory_space<vmem>>, %arg4: memref<256x128xf32, #tpu.memory_space<vmem>>) attributes {dimension_semantics = [#tpu.dimension_semantics<parallel>], iteration_bounds = array<i64: 2>, scalar_prefetch = 0 : i64, scratch_operands = 0 : i64, tpu.core_type = #tpu.core_type<tc>, window_params = [{transform_indices = @transform_0, window_bounds = array<i64: 256, 1024>}, {pipeline_mode = #tpu.pipeline_mode<synchronous>, transform_indices = @transform_1, window_bounds = array<i64: 1024, 128>}, {pipeline_mode = #tpu.pipeline_mode<synchronous>, transform_indices = @transform_2, window_bounds = array<i64: 1, 128>}, {transform_indices = @transform_3, window_bounds = array<i64: 256, 128>}]} {
    %c0 = arith.constant 0 : index
    %c0_0 = arith.constant 0 : index
    %0 = vector.load %arg1[%c0, %c0_0] : memref<256x1024xf32, #tpu.memory_space<vmem>>, vector<256x1024xf32>
    %c0_1 = arith.constant 0 : index
    %c0_2 = arith.constant 0 : index
    %1 = vector.load %arg2[%c0_1, %c0_2] : memref<1024x128xf32, #tpu.memory_space<vmem>>, vector<1024x128xf32>
    %cst = arith.constant dense<0.000000e+00> : vector<256x128xf32>
    %2 = tpu.matmul %0, %1, %cst {dimension_numbers = #tpu.dot_dimension_numbers<[1], [0], [0], [1], [0, 0, 1, 1], [], []>} : vector<256x1024xf32>, vector<1024x128xf32>, vector<256x128xf32> -> vector<256x128xf32>
    %c0_3 = arith.constant 0 : index
    %c0_4 = arith.constant 0 : index
    %3 = vector.load %arg3[%c0_3, %c0_4] : memref<1x128xf32, #tpu.memory_space<vmem>>, vector<1x128xf32>
    %4 = vector.broadcast %3 : vector<1x128xf32> to vector<256x128xf32>
    %5 = arith.addf %2, %4 : vector<256x128xf32>
    %cst_5 = arith.constant 0.000000e+00 : f32
    %6 = vector.broadcast %cst_5 : f32 to vector<256x128xf32>
    %7 = arith.maximumf %5, %6 : vector<256x128xf32>
    %c0_6 = arith.constant 0 : index
    %c0_7 = arith.constant 0 : index
    %8 = vector.load %arg4[%c0_6, %c0_7] : memref<256x128xf32, #tpu.memory_space<vmem>>, vector<256x128xf32>
    tpu.vector_store %arg4[%c0_6, %c0_7], %7 {strides = array<i32>} : memref<256x128xf32, #tpu.memory_space<vmem>>, vector<256x128xf32>,
    return
  }
  func.func @transform_0(%arg0: i32) -> (i32, i32) {
    %c0_i32 = arith.constant 0 : i32
    %c0_i32_0 = arith.constant 0 : i32
    return %arg0, %c0_i32 : i32, i32
  }
  func.func @transform_1(%arg0: i32) -> (i32, i32) {
    %c0_i32 = arith.constant 0 : i32
    %c0_i32_0 = arith.constant 0 : i32
    %c0_i32_1 = arith.constant 0 : i32
    return %c0_i32, %c0_i32_0 : i32, i32
  }
  func.func @transform_2(%arg0: i32) -> (i32, i32) {
    %c0_i32 = arith.constant 0 : i32
    %c0_i32_0 = arith.constant 0 : i32
    %c0_i32_1 = arith.constant 0 : i32
    return %c0_i32, %c0_i32_0 : i32, i32
  }
  func.func @transform_3(%arg0: i32) -> (i32, i32) {
    %c0_i32 = arith.constant 0 : i32
    %c0_i32_0 = arith.constant 0 : i32
    return %arg0, %c0_i32 : i32, i32
  }
}

module attributes {stable_mosaic.version = 11 : i64} {
  func.func @_mlp2_kernel(%arg0: i32, %arg1: memref<48x1024xf32, #tpu.memory_space<vmem>>, %arg2: memref<1024x64xf32, #tpu.memory_space<vmem>>, %arg3: memref<1x64xf32, #tpu.memory_space<vmem>>, %arg4: memref<64x128xf32, #tpu.memory_space<vmem>>, %arg5: memref<1x128xf32, #tpu.memory_space<vmem>>, %arg6: memref<48x128xf32, #tpu.memory_space<vmem>>) attributes {dimension_semantics = [#tpu.dimension_semantics<arbitrary>], iteration_bounds = array<i64: 1>, scalar_prefetch = 0 : i64, scratch_operands = 0 : i64, tpu.core_type = #tpu.core_type<tc>, window_params = [{pipeline_mode = #tpu.pipeline_mode<synchronous>, transform_indices = @transform_0, window_bounds = array<i64: 48, 1024>}, {pipeline_mode = #tpu.pipeline_mode<synchronous>, transform_indices = @transform_1, window_bounds = array<i64: 1024, 64>}, {pipeline_mode = #tpu.pipeline_mode<synchronous>, transform_indices = @transform_2, window_bounds = array<i64: 1, 64>}, {pipeline_mode = #tpu.pipeline_mode<synchronous>, transform_indices = @transform_3, window_bounds = array<i64: 64, 128>}, {pipeline_mode = #tpu.pipeline_mode<synchronous>, transform_indices = @transform_4, window_bounds = array<i64: 1, 128>}, {pipeline_mode = #tpu.pipeline_mode<synchronous>, transform_indices = @transform_5, window_bounds = array<i64: 48, 128>}]} {
    %c0 = arith.constant 0 : index
    %c0_0 = arith.constant 0 : index
    %0 = vector.load %arg1[%c0, %c0_0] : memref<48x1024xf32, #tpu.memory_space<vmem>>, vector<48x1024xf32>
    %c0_1 = arith.constant 0 : index
    %c0_2 = arith.constant 0 : index
    %1 = vector.load %arg2[%c0_1, %c0_2] : memref<1024x64xf32, #tpu.memory_space<vmem>>, vector<1024x64xf32>
    %cst = arith.constant dense<0.000000e+00> : vector<48x64xf32>
    %2 = tpu.matmul %0, %1, %cst {dimension_numbers = #tpu.dot_dimension_numbers<[1], [0], [0], [1], [0, 0, 1, 1], [], []>} : vector<48x1024xf32>, vector<1024x64xf32>, vector<48x64xf32> -> vector<48x64xf32>
    %c0_3 = arith.constant 0 : index
    %c0_4 = arith.constant 0 : index
    %3 = vector.load %arg3[%c0_3, %c0_4] : memref<1x64xf32, #tpu.memory_space<vmem>>, vector<1x64xf32>
    %4 = vector.broadcast %3 : vector<1x64xf32> to vector<48x64xf32>
    %5 = arith.addf %2, %4 : vector<48x64xf32>
    %cst_5 = arith.constant 0.000000e+00 : f32
    %6 = vector.broadcast %cst_5 : f32 to vector<48x64xf32>
    %7 = arith.maximumf %5, %6 : vector<48x64xf32>
    %c0_6 = arith.constant 0 : index
    %c0_7 = arith.constant 0 : index
    %8 = vector.load %arg4[%c0_6, %c0_7] : memref<64x128xf32, #tpu.memory_space<vmem>>, vector<64x128xf32>
    %cst_8 = arith.constant dense<0.000000e+00> : vector<48x128xf32>
    %9 = tpu.matmul %7, %8, %cst_8 {dimension_numbers = #tpu.dot_dimension_numbers<[1], [0], [0], [1], [0, 0, 1, 1], [], []>} : vector<48x64xf32>, vector<64x128xf32>, vector<48x128xf32> -> vector<48x128xf32>
    %c0_9 = arith.constant 0 : index
    %c0_10 = arith.constant 0 : index
    %10 = vector.load %arg5[%c0_9, %c0_10] : memref<1x128xf32, #tpu.memory_space<vmem>>, vector<1x128xf32>
    %11 = vector.broadcast %10 : vector<1x128xf32> to vector<48x128xf32>
    %12 = arith.addf %9, %11 : vector<48x128xf32>
    %cst_11 = arith.constant 0.000000e+00 : f32
    %13 = vector.broadcast %cst_11 : f32 to vector<48x128xf32>
    %14 = arith.maximumf %12, %13 : vector<48x128xf32>
    %c0_12 = arith.constant 0 : index
    %c0_13 = arith.constant 0 : index
    %15 = vector.load %arg6[%c0_12, %c0_13] : memref<48x128xf32, #tpu.memory_space<vmem>>, vector<48x128xf32>
    tpu.vector_store %arg6[%c0_12, %c0_13], %14 {strides = array<i32>} : memref<48x128xf32, #tpu.memory_space<vmem>>, vector<48x128xf32>,
    return
  }
  func.func @transform_0(%arg0: i32) -> (i32, i32) {
    %c0_i32 = arith.constant 0 : i32
    %c0_i32_0 = arith.constant 0 : i32
    %c0_i32_1 = arith.constant 0 : i32
    return %c0_i32, %c0_i32_0 : i32, i32
  }
  func.func @transform_1(%arg0: i32) -> (i32, i32) {
    %c0_i32 = arith.constant 0 : i32
    %c0_i32_0 = arith.constant 0 : i32
    %c0_i32_1 = arith.constant 0 : i32
    return %c0_i32, %c0_i32_0 : i32, i32
  }
  func.func @transform_2(%arg0: i32) -> (i32, i32) {
    %c0_i32 = arith.constant 0 : i32
    %c0_i32_0 = arith.constant 0 : i32
    %c0_i32_1 = arith.constant 0 : i32
    return %c0_i32, %c0_i32_0 : i32, i32
  }
  func.func @transform_3(%arg0: i32) -> (i32, i32) {
    %c0_i32 = arith.constant 0 : i32
    %c0_i32_0 = arith.constant 0 : i32
    %c0_i32_1 = arith.constant 0 : i32
    return %c0_i32, %c0_i32_0 : i32, i32
  }
  func.func @transform_4(%arg0: i32) -> (i32, i32) {
    %c0_i32 = arith.constant 0 : i32
    %c0_i32_0 = arith.constant 0 : i32
    %c0_i32_1 = arith.constant 0 : i32
    return %c0_i32, %c0_i32_0 : i32, i32
  }
  func.func @transform_5(%arg0: i32) -> (i32, i32) {
    %c0_i32 = arith.constant 0 : i32
    %c0_i32_0 = arith.constant 0 : i32
    %c0_i32_1 = arith.constant 0 : i32
    return %c0_i32, %c0_i32_0 : i32, i32
  }
}

module attributes {stable_mosaic.version = 11 : i64} {
  func.func @_mm_bias_kernel(%arg0: i32, %arg1: memref<8x64xf32, #tpu.memory_space<vmem>>, %arg2: memref<64x768xf32, #tpu.memory_space<vmem>>, %arg3: memref<1x768xf32, #tpu.memory_space<vmem>>, %arg4: memref<8x768xf32, #tpu.memory_space<vmem>>) attributes {dimension_semantics = [#tpu.dimension_semantics<parallel>], iteration_bounds = array<i64: 1>, scalar_prefetch = 0 : i64, scratch_operands = 0 : i64, tpu.core_type = #tpu.core_type<tc>, window_params = [{transform_indices = @transform_0, window_bounds = array<i64: 8, 64>}, {pipeline_mode = #tpu.pipeline_mode<synchronous>, transform_indices = @transform_1, window_bounds = array<i64: 64, 768>}, {pipeline_mode = #tpu.pipeline_mode<synchronous>, transform_indices = @transform_2, window_bounds = array<i64: 1, 768>}, {transform_indices = @transform_3, window_bounds = array<i64: 8, 768>}]} {
    %c0 = arith.constant 0 : index
    %c0_0 = arith.constant 0 : index
    %0 = vector.load %arg1[%c0, %c0_0] : memref<8x64xf32, #tpu.memory_space<vmem>>, vector<8x64xf32>
    %c0_1 = arith.constant 0 : index
    %c0_2 = arith.constant 0 : index
    %1 = vector.load %arg2[%c0_1, %c0_2] : memref<64x768xf32, #tpu.memory_space<vmem>>, vector<64x768xf32>
    %cst = arith.constant dense<0.000000e+00> : vector<8x768xf32>
    %2 = tpu.matmul %0, %1, %cst {dimension_numbers = #tpu.dot_dimension_numbers<[1], [0], [0], [1], [0, 0, 1, 1], [], []>} : vector<8x64xf32>, vector<64x768xf32>, vector<8x768xf32> -> vector<8x768xf32>
    %c0_3 = arith.constant 0 : index
    %c0_4 = arith.constant 0 : index
    %3 = vector.load %arg3[%c0_3, %c0_4] : memref<1x768xf32, #tpu.memory_space<vmem>>, vector<1x768xf32>
    %4 = vector.broadcast %3 : vector<1x768xf32> to vector<8x768xf32>
    %5 = arith.addf %2, %4 : vector<8x768xf32>
    %cst_5 = arith.constant 0.000000e+00 : f32
    %6 = vector.broadcast %cst_5 : f32 to vector<8x768xf32>
    %7 = arith.maximumf %5, %6 : vector<8x768xf32>
    %c0_6 = arith.constant 0 : index
    %c0_7 = arith.constant 0 : index
    %8 = vector.load %arg4[%c0_6, %c0_7] : memref<8x768xf32, #tpu.memory_space<vmem>>, vector<8x768xf32>
    tpu.vector_store %arg4[%c0_6, %c0_7], %7 {strides = array<i32>} : memref<8x768xf32, #tpu.memory_space<vmem>>, vector<8x768xf32>,
    return
  }
  func.func @transform_0(%arg0: i32) -> (i32, i32) {
    %c0_i32 = arith.constant 0 : i32
    %c0_i32_0 = arith.constant 0 : i32
    return %arg0, %c0_i32 : i32, i32
  }
  func.func @transform_1(%arg0: i32) -> (i32, i32) {
    %c0_i32 = arith.constant 0 : i32
    %c0_i32_0 = arith.constant 0 : i32
    %c0_i32_1 = arith.constant 0 : i32
    return %c0_i32, %c0_i32_0 : i32, i32
  }
  func.func @transform_2(%arg0: i32) -> (i32, i32) {
    %c0_i32 = arith.constant 0 : i32
    %c0_i32_0 = arith.constant 0 : i32
    %c0_i32_1 = arith.constant 0 : i32
    return %c0_i32, %c0_i32_0 : i32, i32
  }
  func.func @transform_3(%arg0: i32) -> (i32, i32) {
    %c0_i32 = arith.constant 0 : i32
    %c0_i32_0 = arith.constant 0 : i32
    return %arg0, %c0_i32 : i32, i32
  }
}

module attributes {stable_mosaic.version = 11 : i64} {
  func.func @_mm_bias_kernel(%arg0: i32, %arg1: memref<96x128xf32, #tpu.memory_space<vmem>>, %arg2: memref<128x768xf32, #tpu.memory_space<vmem>>, %arg3: memref<1x768xf32, #tpu.memory_space<vmem>>, %arg4: memref<96x768xf32, #tpu.memory_space<vmem>>) attributes {dimension_semantics = [#tpu.dimension_semantics<parallel>], iteration_bounds = array<i64: 1>, scalar_prefetch = 0 : i64, scratch_operands = 0 : i64, tpu.core_type = #tpu.core_type<tc>, window_params = [{transform_indices = @transform_0, window_bounds = array<i64: 96, 128>}, {pipeline_mode = #tpu.pipeline_mode<synchronous>, transform_indices = @transform_1, window_bounds = array<i64: 128, 768>}, {pipeline_mode = #tpu.pipeline_mode<synchronous>, transform_indices = @transform_2, window_bounds = array<i64: 1, 768>}, {transform_indices = @transform_3, window_bounds = array<i64: 96, 768>}]} {
    %c0 = arith.constant 0 : index
    %c0_0 = arith.constant 0 : index
    %0 = vector.load %arg1[%c0, %c0_0] : memref<96x128xf32, #tpu.memory_space<vmem>>, vector<96x128xf32>
    %c0_1 = arith.constant 0 : index
    %c0_2 = arith.constant 0 : index
    %1 = vector.load %arg2[%c0_1, %c0_2] : memref<128x768xf32, #tpu.memory_space<vmem>>, vector<128x768xf32>
    %cst = arith.constant dense<0.000000e+00> : vector<96x768xf32>
    %2 = tpu.matmul %0, %1, %cst {dimension_numbers = #tpu.dot_dimension_numbers<[1], [0], [0], [1], [0, 0, 1, 1], [], []>} : vector<96x128xf32>, vector<128x768xf32>, vector<96x768xf32> -> vector<96x768xf32>
    %c0_3 = arith.constant 0 : index
    %c0_4 = arith.constant 0 : index
    %3 = vector.load %arg3[%c0_3, %c0_4] : memref<1x768xf32, #tpu.memory_space<vmem>>, vector<1x768xf32>
    %4 = vector.broadcast %3 : vector<1x768xf32> to vector<96x768xf32>
    %5 = arith.addf %2, %4 : vector<96x768xf32>
    %cst_5 = arith.constant 0.000000e+00 : f32
    %6 = vector.broadcast %cst_5 : f32 to vector<96x768xf32>
    %7 = arith.maximumf %5, %6 : vector<96x768xf32>
    %c0_6 = arith.constant 0 : index
    %c0_7 = arith.constant 0 : index
    %8 = vector.load %arg4[%c0_6, %c0_7] : memref<96x768xf32, #tpu.memory_space<vmem>>, vector<96x768xf32>
    tpu.vector_store %arg4[%c0_6, %c0_7], %7 {strides = array<i32>} : memref<96x768xf32, #tpu.memory_space<vmem>>, vector<96x768xf32>,
    return
  }
  func.func @transform_0(%arg0: i32) -> (i32, i32) {
    %c0_i32 = arith.constant 0 : i32
    %c0_i32_0 = arith.constant 0 : i32
    return %arg0, %c0_i32 : i32, i32
  }
  func.func @transform_1(%arg0: i32) -> (i32, i32) {
    %c0_i32 = arith.constant 0 : i32
    %c0_i32_0 = arith.constant 0 : i32
    %c0_i32_1 = arith.constant 0 : i32
    return %c0_i32, %c0_i32_0 : i32, i32
  }
  func.func @transform_2(%arg0: i32) -> (i32, i32) {
    %c0_i32 = arith.constant 0 : i32
    %c0_i32_0 = arith.constant 0 : i32
    %c0_i32_1 = arith.constant 0 : i32
    return %c0_i32, %c0_i32_0 : i32, i32
  }
  func.func @transform_3(%arg0: i32) -> (i32, i32) {
    %c0_i32 = arith.constant 0 : i32
    %c0_i32_0 = arith.constant 0 : i32
    return %arg0, %c0_i32 : i32, i32
  }
}

module attributes {stable_mosaic.version = 11 : i64} {
  func.func @_bmm_kernel(%arg0: i32, %arg1: memref<3x48x768xf32, #tpu.memory_space<vmem>>, %arg2: memref<3x768x128xf32, #tpu.memory_space<vmem>>, %arg3: memref<3x48x128xf32, #tpu.memory_space<vmem>>) attributes {dimension_semantics = [#tpu.dimension_semantics<arbitrary>], iteration_bounds = array<i64: 1>, scalar_prefetch = 0 : i64, scratch_operands = 0 : i64, tpu.core_type = #tpu.core_type<tc>, window_params = [{pipeline_mode = #tpu.pipeline_mode<synchronous>, transform_indices = @transform_0, window_bounds = array<i64: 3, 48, 768>}, {pipeline_mode = #tpu.pipeline_mode<synchronous>, transform_indices = @transform_1, window_bounds = array<i64: 3, 768, 128>}, {pipeline_mode = #tpu.pipeline_mode<synchronous>, transform_indices = @transform_2, window_bounds = array<i64: 3, 48, 128>}]} {
    %c0 = arith.constant 0 : index
    %c0_0 = arith.constant 0 : index
    %c0_1 = arith.constant 0 : index
    %0 = vector.load %arg1[%c0, %c0_0, %c0_1] : memref<3x48x768xf32, #tpu.memory_space<vmem>>, vector<1x48x768xf32>
    %1 = vector.shape_cast %0 : vector<1x48x768xf32> to vector<48x768xf32>
    %c0_2 = arith.constant 0 : index
    %c0_3 = arith.constant 0 : index
    %c0_4 = arith.constant 0 : index
    %2 = vector.load %arg2[%c0_2, %c0_3, %c0_4] : memref<3x768x128xf32, #tpu.memory_space<vmem>>, vector<1x768x128xf32>
    %3 = vector.shape_cast %2 : vector<1x768x128xf32> to vector<768x128xf32>
    %cst = arith.constant dense<0.000000e+00> : vector<48x128xf32>
    %4 = tpu.matmul %1, %3, %cst {dimension_numbers = #tpu.dot_dimension_numbers<[1], [0], [0], [1], [0, 0, 1, 1], [], []>} : vector<48x768xf32>, vector<768x128xf32>, vector<48x128xf32> -> vector<48x128xf32>
    %c0_5 = arith.constant 0 : index
    %c0_6 = arith.constant 0 : index
    %c0_7 = arith.constant 0 : index
    %5 = vector.load %arg3[%c0_5, %c0_6, %c0_7] : memref<3x48x128xf32, #tpu.memory_space<vmem>>, vector<1x48x128xf32>
    %6 = vector.shape_cast %5 : vector<1x48x128xf32> to vector<48x128xf32>
    %7 = vector.shape_cast %4 : vector<48x128xf32> to vector<1x48x128xf32>
    tpu.vector_store %arg3[%c0_5, %c0_6, %c0_7], %7 {strides = array<i32>} : memref<3x48x128xf32, #tpu.memory_space<vmem>>, vector<1x48x128xf32>,
    %c1 = arith.constant 1 : index
    %c0_8 = arith.constant 0 : index
    %c0_9 = arith.constant 0 : index
    %8 = vector.load %arg1[%c1, %c0_8, %c0_9] : memref<3x48x768xf32, #tpu.memory_space<vmem>>, vector<1x48x768xf32>
    %9 = vector.shape_cast %8 : vector<1x48x768xf32> to vector<48x768xf32>
    %c1_10 = arith.constant 1 : index
    %c0_11 = arith.constant 0 : index
    %c0_12 = arith.constant 0 : index
    %10 = vector.load %arg2[%c1_10, %c0_11, %c0_12] : memref<3x768x128xf32, #tpu.memory_space<vmem>>, vector<1x768x128xf32>
    %11 = vector.shape_cast %10 : vector<1x768x128xf32> to vector<768x128xf32>
    %cst_13 = arith.constant dense<0.000000e+00> : vector<48x128xf32>
    %12 = tpu.matmul %9, %11, %cst_13 {dimension_numbers = #tpu.dot_dimension_numbers<[1], [0], [0], [1], [0, 0, 1, 1], [], []>} : vector<48x768xf32>, vector<768x128xf32>, vector<48x128xf32> -> vector<48x128xf32>
    %c1_14 = arith.constant 1 : index
    %c0_15 = arith.constant 0 : index
    %c0_16 = arith.constant 0 : index
    %13 = vector.load %arg3[%c1_14, %c0_15, %c0_16] : memref<3x48x128xf32, #tpu.memory_space<vmem>>, vector<1x48x128xf32>
    %14 = vector.shape_cast %13 : vector<1x48x128xf32> to vector<48x128xf32>
    %15 = vector.shape_cast %12 : vector<48x128xf32> to vector<1x48x128xf32>
    tpu.vector_store %arg3[%c1_14, %c0_15, %c0_16], %15 {strides = array<i32>} : memref<3x48x128xf32, #tpu.memory_space<vmem>>, vector<1x48x128xf32>,
    %c2 = arith.constant 2 : index
    %c0_17 = arith.constant 0 : index
    %c0_18 = arith.constant 0 : index
    %16 = vector.load %arg1[%c2, %c0_17, %c0_18] : memref<3x48x768xf32, #tpu.memory_space<vmem>>, vector<1x48x768xf32>
    %17 = vector.shape_cast %16 : vector<1x48x768xf32> to vector<48x768xf32>
    %c2_19 = arith.constant 2 : index
    %c0_20 = arith.constant 0 : index
    %c0_21 = arith.constant 0 : index
    %18 = vector.load %arg2[%c2_19, %c0_20, %c0_21] : memref<3x768x128xf32, #tpu.memory_space<vmem>>, vector<1x768x128xf32>
    %19 = vector.shape_cast %18 : vector<1x768x128xf32> to vector<768x128xf32>
    %cst_22 = arith.constant dense<0.000000e+00> : vector<48x128xf32>
    %20 = tpu.matmul %17, %19, %cst_22 {dimension_numbers = #tpu.dot_dimension_numbers<[1], [0], [0], [1], [0, 0, 1, 1], [], []>} : vector<48x768xf32>, vector<768x128xf32>, vector<48x128xf32> -> vector<48x128xf32>
    %c2_23 = arith.constant 2 : index
    %c0_24 = arith.constant 0 : index
    %c0_25 = arith.constant 0 : index
    %21 = vector.load %arg3[%c2_23, %c0_24, %c0_25] : memref<3x48x128xf32, #tpu.memory_space<vmem>>, vector<1x48x128xf32>
    %22 = vector.shape_cast %21 : vector<1x48x128xf32> to vector<48x128xf32>
    %23 = vector.shape_cast %20 : vector<48x128xf32> to vector<1x48x128xf32>
    tpu.vector_store %arg3[%c2_23, %c0_24, %c0_25], %23 {strides = array<i32>} : memref<3x48x128xf32, #tpu.memory_space<vmem>>, vector<1x48x128xf32>,
    return
  }
  func.func @transform_0(%arg0: i32) -> (i32, i32, i32) {
    %c0_i32 = arith.constant 0 : i32
    %c0_i32_0 = arith.constant 0 : i32
    %c0_i32_1 = arith.constant 0 : i32
    %c0_i32_2 = arith.constant 0 : i32
    return %c0_i32, %c0_i32_0, %c0_i32_1 : i32, i32, i32
  }
  func.func @transform_1(%arg0: i32) -> (i32, i32, i32) {
    %c0_i32 = arith.constant 0 : i32
    %c0_i32_0 = arith.constant 0 : i32
    %c0_i32_1 = arith.constant 0 : i32
    %c0_i32_2 = arith.constant 0 : i32
    return %c0_i32, %c0_i32_0, %c0_i32_1 : i32, i32, i32
  }
  func.func @transform_2(%arg0: i32) -> (i32, i32, i32) {
    %c0_i32 = arith.constant 0 : i32
    %c0_i32_0 = arith.constant 0 : i32
    %c0_i32_1 = arith.constant 0 : i32
    %c0_i32_2 = arith.constant 0 : i32
    return %c0_i32, %c0_i32_0, %c0_i32_1 : i32, i32, i32
  }
}

module attributes {stable_mosaic.version = 11 : i64} {
  func.func @_portrait_attn_kernel(%arg0: i32, %arg1: memref<24x6x128xf32, #tpu.memory_space<vmem>>, %arg2: memref<24x6x128xf32, #tpu.memory_space<vmem>>, %arg3: memref<24x6x128xf32, #tpu.memory_space<vmem>>, %arg4: memref<24x6x6xf32, #tpu.memory_space<vmem>>, %arg5: memref<24x6x128xf32, #tpu.memory_space<vmem>>) attributes {dimension_semantics = [#tpu.dimension_semantics<arbitrary>], iteration_bounds = array<i64: 1>, scalar_prefetch = 0 : i64, scratch_operands = 0 : i64, tpu.core_type = #tpu.core_type<tc>, window_params = [{pipeline_mode = #tpu.pipeline_mode<synchronous>, transform_indices = @transform_0, window_bounds = array<i64: 24, 6, 128>}, {pipeline_mode = #tpu.pipeline_mode<synchronous>, transform_indices = @transform_1, window_bounds = array<i64: 24, 6, 128>}, {pipeline_mode = #tpu.pipeline_mode<synchronous>, transform_indices = @transform_2, window_bounds = array<i64: 24, 6, 128>}, {pipeline_mode = #tpu.pipeline_mode<synchronous>, transform_indices = @transform_3, window_bounds = array<i64: 24, 6, 6>}, {pipeline_mode = #tpu.pipeline_mode<synchronous>, transform_indices = @transform_4, window_bounds = array<i64: 24, 6, 128>}]} {
    %c0 = arith.constant 0 : index
    %c0_0 = arith.constant 0 : index
    %c0_1 = arith.constant 0 : index
    %0 = vector.load %arg1[%c0, %c0_0, %c0_1] : memref<24x6x128xf32, #tpu.memory_space<vmem>>, vector<24x6x128xf32>
    %c0_2 = arith.constant 0 : index
    %c0_3 = arith.constant 0 : index
    %c0_4 = arith.constant 0 : index
    %1 = vector.load %arg2[%c0_2, %c0_3, %c0_4] : memref<24x6x128xf32, #tpu.memory_space<vmem>>, vector<24x6x128xf32>
    %c0_5 = arith.constant 0 : index
    %c0_6 = arith.constant 0 : index
    %c0_7 = arith.constant 0 : index
    %2 = vector.load %arg3[%c0_5, %c0_6, %c0_7] : memref<24x6x128xf32, #tpu.memory_space<vmem>>, vector<24x6x128xf32>
    "tpu.trace_start"() <{level = 10 : i32, message = "bik,bjk->bij"}> : () -> ()
    %cst = arith.constant dense<0.000000e+00> : vector<24x6x6xf32>
    %3 = tpu.matmul %1, %0, %cst {dimension_numbers = #tpu.dot_dimension_numbers<[2], [2], [1], [1], [0, 0, 0, 1, 1, 1], [0], [0]>} : vector<24x6x128xf32>, vector<24x6x128xf32>, vector<24x6x6xf32> -> vector<24x6x6xf32>
    "tpu.trace_stop"() : () -> ()
    %cst_8 = arith.constant dense<0xFF800000> : vector<24x6xf32>
    %4 = vector.multi_reduction <maximumf>, %3, %cst_8 [2] : vector<24x6x6xf32> to vector<24x6xf32>
    %5 = vector.shape_cast %4 : vector<24x6xf32> to vector<24x6x1xf32>
    %6 = vector.broadcast %5 : vector<24x6x1xf32> to vector<24x6x6xf32>
    %7 = arith.subf %3, %6 : vector<24x6x6xf32>
    %8 = math.exp %7 : vector<24x6x6xf32>
    %cst_9 = arith.constant dense<0.000000e+00> : vector<24x6xf32>
    %9 = vector.multi_reduction <add>, %8, %cst_9 [2] : vector<24x6x6xf32> to vector<24x6xf32>
    %10 = vector.shape_cast %9 : vector<24x6xf32> to vector<24x6x1xf32>
    %11 = vector.broadcast %10 : vector<24x6x1xf32> to vector<24x6x6xf32>
    %12 = arith.divf %8, %11 : vector<24x6x6xf32>
    %c0_10 = arith.constant 0 : index
    %c0_11 = arith.constant 0 : index
    %c0_12 = arith.constant 0 : index
    %13 = vector.load %arg4[%c0_10, %c0_11, %c0_12] : memref<24x6x6xf32, #tpu.memory_space<vmem>>, vector<24x6x6xf32>
    tpu.vector_store %arg4[%c0_10, %c0_11, %c0_12], %12 {strides = array<i32>} : memref<24x6x6xf32, #tpu.memory_space<vmem>>, vector<24x6x6xf32>,
    "tpu.trace_start"() <{level = 10 : i32, message = "bij,bjk->bik"}> : () -> ()
    %cst_13 = arith.constant dense<0.000000e+00> : vector<24x6x128xf32>
    %14 = tpu.matmul %12, %2, %cst_13 {dimension_numbers = #tpu.dot_dimension_numbers<[2], [1], [1], [2], [0, 0, 0, 1, 1, 2], [0], [0]>} : vector<24x6x6xf32>, vector<24x6x128xf32>, vector<24x6x128xf32> -> vector<24x6x128xf32>
    "tpu.trace_stop"() : () -> ()
    %c0_14 = arith.constant 0 : index
    %c0_15 = arith.constant 0 : index
    %c0_16 = arith.constant 0 : index
    %15 = vector.load %arg5[%c0_14, %c0_15, %c0_16] : memref<24x6x128xf32, #tpu.memory_space<vmem>>, vector<24x6x128xf32>
    tpu.vector_store %arg5[%c0_14, %c0_15, %c0_16], %14 {strides = array<i32>} : memref<24x6x128xf32, #tpu.memory_space<vmem>>, vector<24x6x128xf32>,
    return
  }
  func.func @transform_0(%arg0: i32) -> (i32, i32, i32) {
    %c0_i32 = arith.constant 0 : i32
    %c0_i32_0 = arith.constant 0 : i32
    %c0_i32_1 = arith.constant 0 : i32
    %c0_i32_2 = arith.constant 0 : i32
    return %c0_i32, %c0_i32_0, %c0_i32_1 : i32, i32, i32
  }
  func.func @transform_1(%arg0: i32) -> (i32, i32, i32) {
    %c0_i32 = arith.constant 0 : i32
    %c0_i32_0 = arith.constant 0 : i32
    %c0_i32_1 = arith.constant 0 : i32
    %c0_i32_2 = arith.constant 0 : i32
    return %c0_i32, %c0_i32_0, %c0_i32_1 : i32, i32, i32
  }
  func.func @transform_2(%arg0: i32) -> (i32, i32, i32) {
    %c0_i32 = arith.constant 0 : i32
    %c0_i32_0 = arith.constant 0 : i32
    %c0_i32_1 = arith.constant 0 : i32
    %c0_i32_2 = arith.constant 0 : i32
    return %c0_i32, %c0_i32_0, %c0_i32_1 : i32, i32, i32
  }
  func.func @transform_3(%arg0: i32) -> (i32, i32, i32) {
    %c0_i32 = arith.constant 0 : i32
    %c0_i32_0 = arith.constant 0 : i32
    %c0_i32_1 = arith.constant 0 : i32
    %c0_i32_2 = arith.constant 0 : i32
    return %c0_i32, %c0_i32_0, %c0_i32_1 : i32, i32, i32
  }
  func.func @transform_4(%arg0: i32) -> (i32, i32, i32) {
    %c0_i32 = arith.constant 0 : i32
    %c0_i32_0 = arith.constant 0 : i32
    %c0_i32_1 = arith.constant 0 : i32
    %c0_i32_2 = arith.constant 0 : i32
    return %c0_i32, %c0_i32_0, %c0_i32_1 : i32, i32, i32
  }
}

module attributes {stable_mosaic.version = 11 : i64} {
  func.func @_bmm_kernel(%arg0: i32, %arg1: memref<8x6x6xf32, #tpu.memory_space<vmem>>, %arg2: memref<8x6x128xf32, #tpu.memory_space<vmem>>, %arg3: memref<8x6x128xf32, #tpu.memory_space<vmem>>) attributes {dimension_semantics = [#tpu.dimension_semantics<arbitrary>], iteration_bounds = array<i64: 1>, scalar_prefetch = 0 : i64, scratch_operands = 0 : i64, tpu.core_type = #tpu.core_type<tc>, window_params = [{pipeline_mode = #tpu.pipeline_mode<synchronous>, transform_indices = @transform_0, window_bounds = array<i64: 8, 6, 6>}, {pipeline_mode = #tpu.pipeline_mode<synchronous>, transform_indices = @transform_1, window_bounds = array<i64: 8, 6, 128>}, {pipeline_mode = #tpu.pipeline_mode<synchronous>, transform_indices = @transform_2, window_bounds = array<i64: 8, 6, 128>}]} {
    %c0 = arith.constant 0 : index
    %c0_0 = arith.constant 0 : index
    %c0_1 = arith.constant 0 : index
    %0 = vector.load %arg1[%c0, %c0_0, %c0_1] : memref<8x6x6xf32, #tpu.memory_space<vmem>>, vector<1x6x6xf32>
    %1 = vector.shape_cast %0 : vector<1x6x6xf32> to vector<6x6xf32>
    %c0_2 = arith.constant 0 : index
    %c0_3 = arith.constant 0 : index
    %c0_4 = arith.constant 0 : index
    %2 = vector.load %arg2[%c0_2, %c0_3, %c0_4] : memref<8x6x128xf32, #tpu.memory_space<vmem>>, vector<1x6x128xf32>
    %3 = vector.shape_cast %2 : vector<1x6x128xf32> to vector<6x128xf32>
    %cst = arith.constant dense<0.000000e+00> : vector<6x128xf32>
    %4 = tpu.matmul %1, %3, %cst {dimension_numbers = #tpu.dot_dimension_numbers<[1], [0], [0], [1], [0, 0, 1, 1], [], []>} : vector<6x6xf32>, vector<6x128xf32>, vector<6x128xf32> -> vector<6x128xf32>
    %c0_5 = arith.constant 0 : index
    %c0_6 = arith.constant 0 : index
    %c0_7 = arith.constant 0 : index
    %5 = vector.load %arg3[%c0_5, %c0_6, %c0_7] : memref<8x6x128xf32, #tpu.memory_space<vmem>>, vector<1x6x128xf32>
    %6 = vector.shape_cast %5 : vector<1x6x128xf32> to vector<6x128xf32>
    %7 = vector.shape_cast %4 : vector<6x128xf32> to vector<1x6x128xf32>
    tpu.vector_store %arg3[%c0_5, %c0_6, %c0_7], %7 {strides = array<i32>} : memref<8x6x128xf32, #tpu.memory_space<vmem>>, vector<1x6x128xf32>,
    %c1 = arith.constant 1 : index
    %c0_8 = arith.constant 0 : index
    %c0_9 = arith.constant 0 : index
    %8 = vector.load %arg1[%c1, %c0_8, %c0_9] : memref<8x6x6xf32, #tpu.memory_space<vmem>>, vector<1x6x6xf32>
    %9 = vector.shape_cast %8 : vector<1x6x6xf32> to vector<6x6xf32>
    %c1_10 = arith.constant 1 : index
    %c0_11 = arith.constant 0 : index
    %c0_12 = arith.constant 0 : index
    %10 = vector.load %arg2[%c1_10, %c0_11, %c0_12] : memref<8x6x128xf32, #tpu.memory_space<vmem>>, vector<1x6x128xf32>
    %11 = vector.shape_cast %10 : vector<1x6x128xf32> to vector<6x128xf32>
    %cst_13 = arith.constant dense<0.000000e+00> : vector<6x128xf32>
    %12 = tpu.matmul %9, %11, %cst_13 {dimension_numbers = #tpu.dot_dimension_numbers<[1], [0], [0], [1], [0, 0, 1, 1], [], []>} : vector<6x6xf32>, vector<6x128xf32>, vector<6x128xf32> -> vector<6x128xf32>
    %c1_14 = arith.constant 1 : index
    %c0_15 = arith.constant 0 : index
    %c0_16 = arith.constant 0 : index
    %13 = vector.load %arg3[%c1_14, %c0_15, %c0_16] : memref<8x6x128xf32, #tpu.memory_space<vmem>>, vector<1x6x128xf32>
    %14 = vector.shape_cast %13 : vector<1x6x128xf32> to vector<6x128xf32>
    %15 = vector.shape_cast %12 : vector<6x128xf32> to vector<1x6x128xf32>
    tpu.vector_store %arg3[%c1_14, %c0_15, %c0_16], %15 {strides = array<i32>} : memref<8x6x128xf32, #tpu.memory_space<vmem>>, vector<1x6x128xf32>,
    %c2 = arith.constant 2 : index
    %c0_17 = arith.constant 0 : index
    %c0_18 = arith.constant 0 : index
    %16 = vector.load %arg1[%c2, %c0_17, %c0_18] : memref<8x6x6xf32, #tpu.memory_space<vmem>>, vector<1x6x6xf32>
    %17 = vector.shape_cast %16 : vector<1x6x6xf32> to vector<6x6xf32>
    %c2_19 = arith.constant 2 : index
    %c0_20 = arith.constant 0 : index
    %c0_21 = arith.constant 0 : index
    %18 = vector.load %arg2[%c2_19, %c0_20, %c0_21] : memref<8x6x128xf32, #tpu.memory_space<vmem>>, vector<1x6x128xf32>
    %19 = vector.shape_cast %18 : vector<1x6x128xf32> to vector<6x128xf32>
    %cst_22 = arith.constant dense<0.000000e+00> : vector<6x128xf32>
    %20 = tpu.matmul %17, %19, %cst_22 {dimension_numbers = #tpu.dot_dimension_numbers<[1], [0], [0], [1], [0, 0, 1, 1], [], []>} : vector<6x6xf32>, vector<6x128xf32>, vector<6x128xf32> -> vector<6x128xf32>
    %c2_23 = arith.constant 2 : index
    %c0_24 = arith.constant 0 : index
    %c0_25 = arith.constant 0 : index
    %21 = vector.load %arg3[%c2_23, %c0_24, %c0_25] : memref<8x6x128xf32, #tpu.memory_space<vmem>>, vector<1x6x128xf32>
    %22 = vector.shape_cast %21 : vector<1x6x128xf32> to vector<6x128xf32>
    %23 = vector.shape_cast %20 : vector<6x128xf32> to vector<1x6x128xf32>
    tpu.vector_store %arg3[%c2_23, %c0_24, %c0_25], %23 {strides = array<i32>} : memref<8x6x128xf32, #tpu.memory_space<vmem>>, vector<1x6x128xf32>,
    %c3 = arith.constant 3 : index
    %c0_26 = arith.constant 0 : index
    %c0_27 = arith.constant 0 : index
    %24 = vector.load %arg1[%c3, %c0_26, %c0_27] : memref<8x6x6xf32, #tpu.memory_space<vmem>>, vector<1x6x6xf32>
    %25 = vector.shape_cast %24 : vector<1x6x6xf32> to vector<6x6xf32>
    %c3_28 = arith.constant 3 : index
    %c0_29 = arith.constant 0 : index
    %c0_30 = arith.constant 0 : index
    %26 = vector.load %arg2[%c3_28, %c0_29, %c0_30] : memref<8x6x128xf32, #tpu.memory_space<vmem>>, vector<1x6x128xf32>
    %27 = vector.shape_cast %26 : vector<1x6x128xf32> to vector<6x128xf32>
    %cst_31 = arith.constant dense<0.000000e+00> : vector<6x128xf32>
    %28 = tpu.matmul %25, %27, %cst_31 {dimension_numbers = #tpu.dot_dimension_numbers<[1], [0], [0], [1], [0, 0, 1, 1], [], []>} : vector<6x6xf32>, vector<6x128xf32>, vector<6x128xf32> -> vector<6x128xf32>
    %c3_32 = arith.constant 3 : index
    %c0_33 = arith.constant 0 : index
    %c0_34 = arith.constant 0 : index
    %29 = vector.load %arg3[%c3_32, %c0_33, %c0_34] : memref<8x6x128xf32, #tpu.memory_space<vmem>>, vector<1x6x128xf32>
    %30 = vector.shape_cast %29 : vector<1x6x128xf32> to vector<6x128xf32>
    %31 = vector.shape_cast %28 : vector<6x128xf32> to vector<1x6x128xf32>
    tpu.vector_store %arg3[%c3_32, %c0_33, %c0_34], %31 {strides = array<i32>} : memref<8x6x128xf32, #tpu.memory_space<vmem>>, vector<1x6x128xf32>,
    %c4 = arith.constant 4 : index
    %c0_35 = arith.constant 0 : index
    %c0_36 = arith.constant 0 : index
    %32 = vector.load %arg1[%c4, %c0_35, %c0_36] : memref<8x6x6xf32, #tpu.memory_space<vmem>>, vector<1x6x6xf32>
    %33 = vector.shape_cast %32 : vector<1x6x6xf32> to vector<6x6xf32>
    %c4_37 = arith.constant 4 : index
    %c0_38 = arith.constant 0 : index
    %c0_39 = arith.constant 0 : index
    %34 = vector.load %arg2[%c4_37, %c0_38, %c0_39] : memref<8x6x128xf32, #tpu.memory_space<vmem>>, vector<1x6x128xf32>
    %35 = vector.shape_cast %34 : vector<1x6x128xf32> to vector<6x128xf32>
    %cst_40 = arith.constant dense<0.000000e+00> : vector<6x128xf32>
    %36 = tpu.matmul %33, %35, %cst_40 {dimension_numbers = #tpu.dot_dimension_numbers<[1], [0], [0], [1], [0, 0, 1, 1], [], []>} : vector<6x6xf32>, vector<6x128xf32>, vector<6x128xf32> -> vector<6x128xf32>
    %c4_41 = arith.constant 4 : index
    %c0_42 = arith.constant 0 : index
    %c0_43 = arith.constant 0 : index
    %37 = vector.load %arg3[%c4_41, %c0_42, %c0_43] : memref<8x6x128xf32, #tpu.memory_space<vmem>>, vector<1x6x128xf32>
    %38 = vector.shape_cast %37 : vector<1x6x128xf32> to vector<6x128xf32>
    %39 = vector.shape_cast %36 : vector<6x128xf32> to vector<1x6x128xf32>
    tpu.vector_store %arg3[%c4_41, %c0_42, %c0_43], %39 {strides = array<i32>} : memref<8x6x128xf32, #tpu.memory_space<vmem>>, vector<1x6x128xf32>,
    %c5 = arith.constant 5 : index
    %c0_44 = arith.constant 0 : index
    %c0_45 = arith.constant 0 : index
    %40 = vector.load %arg1[%c5, %c0_44, %c0_45] : memref<8x6x6xf32, #tpu.memory_space<vmem>>, vector<1x6x6xf32>
    %41 = vector.shape_cast %40 : vector<1x6x6xf32> to vector<6x6xf32>
    %c5_46 = arith.constant 5 : index
    %c0_47 = arith.constant 0 : index
    %c0_48 = arith.constant 0 : index
    %42 = vector.load %arg2[%c5_46, %c0_47, %c0_48] : memref<8x6x128xf32, #tpu.memory_space<vmem>>, vector<1x6x128xf32>
    %43 = vector.shape_cast %42 : vector<1x6x128xf32> to vector<6x128xf32>
    %cst_49 = arith.constant dense<0.000000e+00> : vector<6x128xf32>
    %44 = tpu.matmul %41, %43, %cst_49 {dimension_numbers = #tpu.dot_dimension_numbers<[1], [0], [0], [1], [0, 0, 1, 1], [], []>} : vector<6x6xf32>, vector<6x128xf32>, vector<6x128xf32> -> vector<6x128xf32>
    %c5_50 = arith.constant 5 : index
    %c0_51 = arith.constant 0 : index
    %c0_52 = arith.constant 0 : index
    %45 = vector.load %arg3[%c5_50, %c0_51, %c0_52] : memref<8x6x128xf32, #tpu.memory_space<vmem>>, vector<1x6x128xf32>
    %46 = vector.shape_cast %45 : vector<1x6x128xf32> to vector<6x128xf32>
    %47 = vector.shape_cast %44 : vector<6x128xf32> to vector<1x6x128xf32>
    tpu.vector_store %arg3[%c5_50, %c0_51, %c0_52], %47 {strides = array<i32>} : memref<8x6x128xf32, #tpu.memory_space<vmem>>, vector<1x6x128xf32>,
    %c6 = arith.constant 6 : index
    %c0_53 = arith.constant 0 : index
    %c0_54 = arith.constant 0 : index
    %48 = vector.load %arg1[%c6, %c0_53, %c0_54] : memref<8x6x6xf32, #tpu.memory_space<vmem>>, vector<1x6x6xf32>
    %49 = vector.shape_cast %48 : vector<1x6x6xf32> to vector<6x6xf32>
    %c6_55 = arith.constant 6 : index
    %c0_56 = arith.constant 0 : index
    %c0_57 = arith.constant 0 : index
    %50 = vector.load %arg2[%c6_55, %c0_56, %c0_57] : memref<8x6x128xf32, #tpu.memory_space<vmem>>, vector<1x6x128xf32>
    %51 = vector.shape_cast %50 : vector<1x6x128xf32> to vector<6x128xf32>
    %cst_58 = arith.constant dense<0.000000e+00> : vector<6x128xf32>
    %52 = tpu.matmul %49, %51, %cst_58 {dimension_numbers = #tpu.dot_dimension_numbers<[1], [0], [0], [1], [0, 0, 1, 1], [], []>} : vector<6x6xf32>, vector<6x128xf32>, vector<6x128xf32> -> vector<6x128xf32>
    %c6_59 = arith.constant 6 : index
    %c0_60 = arith.constant 0 : index
    %c0_61 = arith.constant 0 : index
    %53 = vector.load %arg3[%c6_59, %c0_60, %c0_61] : memref<8x6x128xf32, #tpu.memory_space<vmem>>, vector<1x6x128xf32>
    %54 = vector.shape_cast %53 : vector<1x6x128xf32> to vector<6x128xf32>
    %55 = vector.shape_cast %52 : vector<6x128xf32> to vector<1x6x128xf32>
    tpu.vector_store %arg3[%c6_59, %c0_60, %c0_61], %55 {strides = array<i32>} : memref<8x6x128xf32, #tpu.memory_space<vmem>>, vector<1x6x128xf32>,
    %c7 = arith.constant 7 : index
    %c0_62 = arith.constant 0 : index
    %c0_63 = arith.constant 0 : index
    %56 = vector.load %arg1[%c7, %c0_62, %c0_63] : memref<8x6x6xf32, #tpu.memory_space<vmem>>, vector<1x6x6xf32>
    %57 = vector.shape_cast %56 : vector<1x6x6xf32> to vector<6x6xf32>
    %c7_64 = arith.constant 7 : index
    %c0_65 = arith.constant 0 : index
    %c0_66 = arith.constant 0 : index
    %58 = vector.load %arg2[%c7_64, %c0_65, %c0_66] : memref<8x6x128xf32, #tpu.memory_space<vmem>>, vector<1x6x128xf32>
    %59 = vector.shape_cast %58 : vector<1x6x128xf32> to vector<6x128xf32>
    %cst_67 = arith.constant dense<0.000000e+00> : vector<6x128xf32>
    %60 = tpu.matmul %57, %59, %cst_67 {dimension_numbers = #tpu.dot_dimension_numbers<[1], [0], [0], [1], [0, 0, 1, 1], [], []>} : vector<6x6xf32>, vector<6x128xf32>, vector<6x128xf32> -> vector<6x128xf32>
    %c7_68 = arith.constant 7 : index
    %c0_69 = arith.constant 0 : index
    %c0_70 = arith.constant 0 : index
    %61 = vector.load %arg3[%c7_68, %c0_69, %c0_70] : memref<8x6x128xf32, #tpu.memory_space<vmem>>, vector<1x6x128xf32>
    %62 = vector.shape_cast %61 : vector<1x6x128xf32> to vector<6x128xf32>
    %63 = vector.shape_cast %60 : vector<6x128xf32> to vector<1x6x128xf32>
    tpu.vector_store %arg3[%c7_68, %c0_69, %c0_70], %63 {strides = array<i32>} : memref<8x6x128xf32, #tpu.memory_space<vmem>>, vector<1x6x128xf32>,
    return
  }
  func.func @transform_0(%arg0: i32) -> (i32, i32, i32) {
    %c0_i32 = arith.constant 0 : i32
    %c0_i32_0 = arith.constant 0 : i32
    %c0_i32_1 = arith.constant 0 : i32
    %c0_i32_2 = arith.constant 0 : i32
    return %c0_i32, %c0_i32_0, %c0_i32_1 : i32, i32, i32
  }
  func.func @transform_1(%arg0: i32) -> (i32, i32, i32) {
    %c0_i32 = arith.constant 0 : i32
    %c0_i32_0 = arith.constant 0 : i32
    %c0_i32_1 = arith.constant 0 : i32
    %c0_i32_2 = arith.constant 0 : i32
    return %c0_i32, %c0_i32_0, %c0_i32_1 : i32, i32, i32
  }
  func.func @transform_2(%arg0: i32) -> (i32, i32, i32) {
    %c0_i32 = arith.constant 0 : i32
    %c0_i32_0 = arith.constant 0 : i32
    %c0_i32_1 = arith.constant 0 : i32
    %c0_i32_2 = arith.constant 0 : i32
    return %c0_i32, %c0_i32_0, %c0_i32_1 : i32, i32, i32
  }
}

module attributes {stable_mosaic.version = 11 : i64} {
  func.func @_mm_bias_kernel(%arg0: i32, %arg1: memref<8x72xf32, #tpu.memory_space<vmem>>, %arg2: memref<72x36xf32, #tpu.memory_space<vmem>>, %arg3: memref<1x36xf32, #tpu.memory_space<vmem>>, %arg4: memref<8x36xf32, #tpu.memory_space<vmem>>) attributes {dimension_semantics = [#tpu.dimension_semantics<parallel>], iteration_bounds = array<i64: 1>, scalar_prefetch = 0 : i64, scratch_operands = 0 : i64, tpu.core_type = #tpu.core_type<tc>, window_params = [{transform_indices = @transform_0, window_bounds = array<i64: 8, 72>}, {pipeline_mode = #tpu.pipeline_mode<synchronous>, transform_indices = @transform_1, window_bounds = array<i64: 72, 36>}, {pipeline_mode = #tpu.pipeline_mode<synchronous>, transform_indices = @transform_2, window_bounds = array<i64: 1, 36>}, {transform_indices = @transform_3, window_bounds = array<i64: 8, 36>}]} {
    %c0 = arith.constant 0 : index
    %c0_0 = arith.constant 0 : index
    %0 = vector.load %arg1[%c0, %c0_0] : memref<8x72xf32, #tpu.memory_space<vmem>>, vector<8x72xf32>
    %c0_1 = arith.constant 0 : index
    %c0_2 = arith.constant 0 : index
    %1 = vector.load %arg2[%c0_1, %c0_2] : memref<72x36xf32, #tpu.memory_space<vmem>>, vector<72x36xf32>
    %cst = arith.constant dense<0.000000e+00> : vector<8x36xf32>
    %2 = tpu.matmul %0, %1, %cst {dimension_numbers = #tpu.dot_dimension_numbers<[1], [0], [0], [1], [0, 0, 1, 1], [], []>} : vector<8x72xf32>, vector<72x36xf32>, vector<8x36xf32> -> vector<8x36xf32>
    %c0_3 = arith.constant 0 : index
    %c0_4 = arith.constant 0 : index
    %3 = vector.load %arg3[%c0_3, %c0_4] : memref<1x36xf32, #tpu.memory_space<vmem>>, vector<1x36xf32>
    %4 = vector.broadcast %3 : vector<1x36xf32> to vector<8x36xf32>
    %5 = arith.addf %2, %4 : vector<8x36xf32>
    %c0_5 = arith.constant 0 : index
    %c0_6 = arith.constant 0 : index
    %6 = vector.load %arg4[%c0_5, %c0_6] : memref<8x36xf32, #tpu.memory_space<vmem>>, vector<8x36xf32>
    tpu.vector_store %arg4[%c0_5, %c0_6], %5 {strides = array<i32>} : memref<8x36xf32, #tpu.memory_space<vmem>>, vector<8x36xf32>,
    return
  }
  func.func @transform_0(%arg0: i32) -> (i32, i32) {
    %c0_i32 = arith.constant 0 : i32
    %c0_i32_0 = arith.constant 0 : i32
    return %arg0, %c0_i32 : i32, i32
  }
  func.func @transform_1(%arg0: i32) -> (i32, i32) {
    %c0_i32 = arith.constant 0 : i32
    %c0_i32_0 = arith.constant 0 : i32
    %c0_i32_1 = arith.constant 0 : i32
    return %c0_i32, %c0_i32_0 : i32, i32
  }
  func.func @transform_2(%arg0: i32) -> (i32, i32) {
    %c0_i32 = arith.constant 0 : i32
    %c0_i32_0 = arith.constant 0 : i32
    %c0_i32_1 = arith.constant 0 : i32
    return %c0_i32, %c0_i32_0 : i32, i32
  }
  func.func @transform_3(%arg0: i32) -> (i32, i32) {
    %c0_i32 = arith.constant 0 : i32
    %c0_i32_0 = arith.constant 0 : i32
    return %arg0, %c0_i32 : i32, i32
  }
}

module attributes {stable_mosaic.version = 11 : i64} {
  func.func @_tail_kernel(%arg0: i32, %arg1: memref<48x768xf32, #tpu.memory_space<vmem>>, %arg2: memref<48x768xf32, #tpu.memory_space<vmem>>, %arg3: memref<48x768xf32, #tpu.memory_space<vmem>>, %arg4: memref<48x1536xf32, #tpu.memory_space<vmem>>, %arg5: memref<768x256xf32, #tpu.memory_space<vmem>>, %arg6: memref<768x128xf32, #tpu.memory_space<vmem>>, %arg7: memref<768x128xf32, #tpu.memory_space<vmem>>, %arg8: memref<1536x128xf32, #tpu.memory_space<vmem>>, %arg9: memref<48x128xf32, #tpu.memory_space<vmem>>, %arg10: memref<48x128xf32, #tpu.memory_space<vmem>>, %arg11: memref<48x128xf32, #tpu.memory_space<vmem>>) attributes {dimension_semantics = [#tpu.dimension_semantics<arbitrary>], iteration_bounds = array<i64: 1>, scalar_prefetch = 0 : i64, scratch_operands = 0 : i64, tpu.core_type = #tpu.core_type<tc>, window_params = [{pipeline_mode = #tpu.pipeline_mode<synchronous>, transform_indices = @transform_0, window_bounds = array<i64: 48, 768>}, {pipeline_mode = #tpu.pipeline_mode<synchronous>, transform_indices = @transform_1, window_bounds = array<i64: 48, 768>}, {pipeline_mode = #tpu.pipeline_mode<synchronous>, transform_indices = @transform_2, window_bounds = array<i64: 48, 768>}, {pipeline_mode = #tpu.pipeline_mode<synchronous>, transform_indices = @transform_3, window_bounds = array<i64: 48, 1536>}, {pipeline_mode = #tpu.pipeline_mode<synchronous>, transform_indices = @transform_4, window_bounds = array<i64: 768, 256>}, {pipeline_mode = #tpu.pipeline_mode<synchronous>, transform_indices = @transform_5, window_bounds = array<i64: 768, 128>}, {pipeline_mode = #tpu.pipeline_mode<synchronous>, transform_indices = @transform_6, window_bounds = array<i64: 768, 128>}, {pipeline_mode = #tpu.pipeline_mode<synchronous>, transform_indices = @transform_7, window_bounds = array<i64: 1536, 128>}, {pipeline_mode = #tpu.pipeline_mode<synchronous>, transform_indices = @transform_8, window_bounds = array<i64: 48, 128>}, {pipeline_mode = #tpu.pipeline_mode<synchronous>, transform_indices = @transform_9, window_bounds = array<i64: 48, 128>}, {pipeline_mode = #tpu.pipeline_mode<synchronous>, transform_indices = @transform_10, window_bounds = array<i64: 48, 128>}]} {
    %c0 = arith.constant 0 : index
    %c0_0 = arith.constant 0 : index
    %0 = vector.load %arg1[%c0, %c0_0] : memref<48x768xf32, #tpu.memory_space<vmem>>, vector<48x768xf32>
    %c0_1 = arith.constant 0 : index
    %c0_2 = arith.constant 0 : index
    %1 = vector.load %arg5[%c0_1, %c0_2] : memref<768x256xf32, #tpu.memory_space<vmem>>, vector<768x256xf32>
    %cst = arith.constant dense<0.000000e+00> : vector<48x256xf32>
    %2 = tpu.matmul %0, %1, %cst {dimension_numbers = #tpu.dot_dimension_numbers<[1], [0], [0], [1], [0, 0, 1, 1], [], []>} : vector<48x768xf32>, vector<768x256xf32>, vector<48x256xf32> -> vector<48x256xf32>
    %cst_3 = arith.constant 0.000000e+00 : f32
    %3 = vector.broadcast %cst_3 : f32 to vector<48x256xf32>
    %4 = arith.maximumf %2, %3 : vector<48x256xf32>
    %c0_4 = arith.constant 0 : index
    %c0_5 = arith.constant 0 : index
    %5 = vector.load %arg2[%c0_4, %c0_5] : memref<48x768xf32, #tpu.memory_space<vmem>>, vector<48x768xf32>
    %c0_6 = arith.constant 0 : index
    %c0_7 = arith.constant 0 : index
    %6 = vector.load %arg6[%c0_6, %c0_7] : memref<768x128xf32, #tpu.memory_space<vmem>>, vector<768x128xf32>
    %cst_8 = arith.constant dense<0.000000e+00> : vector<48x128xf32>
    %7 = tpu.matmul %5, %6, %cst_8 {dimension_numbers = #tpu.dot_dimension_numbers<[1], [0], [0], [1], [0, 0, 1, 1], [], []>} : vector<48x768xf32>, vector<768x128xf32>, vector<48x128xf32> -> vector<48x128xf32>
    %cst_9 = arith.constant dense<0xFF800000> : vector<48xf32>
    %8 = vector.multi_reduction <maximumf>, %7, %cst_9 [1] : vector<48x128xf32> to vector<48xf32>
    %9 = vector.shape_cast %8 : vector<48xf32> to vector<48x1xf32>
    %10 = vector.broadcast %9 : vector<48x1xf32> to vector<48x128xf32>
    %11 = arith.subf %7, %10 : vector<48x128xf32>
    %12 = math.exp %11 : vector<48x128xf32>
    %cst_10 = arith.constant dense<0.000000e+00> : vector<48xf32>
    %13 = vector.multi_reduction <add>, %12, %cst_10 [1] : vector<48x128xf32> to vector<48xf32>
    %14 = vector.shape_cast %13 : vector<48xf32> to vector<48x1xf32>
    %15 = vector.broadcast %14 : vector<48x1xf32> to vector<48x128xf32>
    %16 = arith.divf %12, %15 : vector<48x128xf32>
    %c0_11 = arith.constant 0 : index
    %c0_12 = arith.constant 0 : index
    %17 = vector.load %arg3[%c0_11, %c0_12] : memref<48x768xf32, #tpu.memory_space<vmem>>, vector<48x768xf32>
    %c0_13 = arith.constant 0 : index
    %c0_14 = arith.constant 0 : index
    %18 = vector.load %arg7[%c0_13, %c0_14] : memref<768x128xf32, #tpu.memory_space<vmem>>, vector<768x128xf32>
    %cst_15 = arith.constant dense<0.000000e+00> : vector<48x128xf32>
    %19 = tpu.matmul %17, %18, %cst_15 {dimension_numbers = #tpu.dot_dimension_numbers<[1], [0], [0], [1], [0, 0, 1, 1], [], []>} : vector<48x768xf32>, vector<768x128xf32>, vector<48x128xf32> -> vector<48x128xf32>
    %cst_16 = arith.constant dense<0xFF800000> : vector<48xf32>
    %20 = vector.multi_reduction <maximumf>, %19, %cst_16 [1] : vector<48x128xf32> to vector<48xf32>
    %21 = vector.shape_cast %20 : vector<48xf32> to vector<48x1xf32>
    %22 = vector.broadcast %21 : vector<48x1xf32> to vector<48x128xf32>
    %23 = arith.subf %19, %22 : vector<48x128xf32>
    %24 = math.exp %23 : vector<48x128xf32>
    %cst_17 = arith.constant dense<0.000000e+00> : vector<48xf32>
    %25 = vector.multi_reduction <add>, %24, %cst_17 [1] : vector<48x128xf32> to vector<48xf32>
    %26 = vector.shape_cast %25 : vector<48xf32> to vector<48x1xf32>
    %27 = vector.broadcast %26 : vector<48x1xf32> to vector<48x128xf32>
    %28 = arith.divf %24, %27 : vector<48x128xf32>
    %c0_18 = arith.constant 0 : index
    %c0_19 = arith.constant 0 : index
    %29 = vector.load %arg4[%c0_18, %c0_19] : memref<48x1536xf32, #tpu.memory_space<vmem>>, vector<48x1536xf32>
    %c0_20 = arith.constant 0 : index
    %c0_21 = arith.constant 0 : index
    %30 = vector.load %arg8[%c0_20, %c0_21] : memref<1536x128xf32, #tpu.memory_space<vmem>>, vector<1536x128xf32>
    %cst_22 = arith.constant dense<0.000000e+00> : vector<48x128xf32>
    %31 = tpu.matmul %29, %30, %cst_22 {dimension_numbers = #tpu.dot_dimension_numbers<[1], [0], [0], [1], [0, 0, 1, 1], [], []>} : vector<48x1536xf32>, vector<1536x128xf32>, vector<48x128xf32> -> vector<48x128xf32>
    %cst_23 = arith.constant dense<0xFF800000> : vector<48xf32>
    %32 = vector.multi_reduction <maximumf>, %31, %cst_23 [1] : vector<48x128xf32> to vector<48xf32>
    %33 = vector.shape_cast %32 : vector<48xf32> to vector<48x1xf32>
    %34 = vector.broadcast %33 : vector<48x1xf32> to vector<48x128xf32>
    %35 = arith.subf %31, %34 : vector<48x128xf32>
    %36 = math.exp %35 : vector<48x128xf32>
    %cst_24 = arith.constant dense<0.000000e+00> : vector<48xf32>
    %37 = vector.multi_reduction <add>, %36, %cst_24 [1] : vector<48x128xf32> to vector<48xf32>
    %38 = vector.shape_cast %37 : vector<48xf32> to vector<48x1xf32>
    %39 = vector.broadcast %38 : vector<48x1xf32> to vector<48x128xf32>
    %40 = arith.divf %36, %39 : vector<48x128xf32>
    %41 = vector.extract_strided_slice %4 {offsets = [0, 0], sizes = [48, 128], strides = [1, 1]} : vector<48x256xf32> to vector<48x128xf32>
    %42 = arith.mulf %41, %16 : vector<48x128xf32>
    %c0_25 = arith.constant 0 : index
    %c0_26 = arith.constant 0 : index
    %43 = vector.load %arg9[%c0_25, %c0_26] : memref<48x128xf32, #tpu.memory_space<vmem>>, vector<48x128xf32>
    tpu.vector_store %arg9[%c0_25, %c0_26], %42 {strides = array<i32>} : memref<48x128xf32, #tpu.memory_space<vmem>>, vector<48x128xf32>,
    %44 = vector.extract_strided_slice %4 {offsets = [0, 128], sizes = [48, 128], strides = [1, 1]} : vector<48x256xf32> to vector<48x128xf32>
    %45 = arith.mulf %44, %28 : vector<48x128xf32>
    %c0_27 = arith.constant 0 : index
    %c0_28 = arith.constant 0 : index
    %46 = vector.load %arg10[%c0_27, %c0_28] : memref<48x128xf32, #tpu.memory_space<vmem>>, vector<48x128xf32>
    tpu.vector_store %arg10[%c0_27, %c0_28], %45 {strides = array<i32>} : memref<48x128xf32, #tpu.memory_space<vmem>>, vector<48x128xf32>,
    %47 = vector.extract_strided_slice %4 {offsets = [0, 128], sizes = [48, 128], strides = [1, 1]} : vector<48x256xf32> to vector<48x128xf32>
    %48 = arith.mulf %47, %40 : vector<48x128xf32>
    %c0_29 = arith.constant 0 : index
    %c0_30 = arith.constant 0 : index
    %49 = vector.load %arg11[%c0_29, %c0_30] : memref<48x128xf32, #tpu.memory_space<vmem>>, vector<48x128xf32>
    tpu.vector_store %arg11[%c0_29, %c0_30], %48 {strides = array<i32>} : memref<48x128xf32, #tpu.memory_space<vmem>>, vector<48x128xf32>,
    return
  }
  func.func @transform_0(%arg0: i32) -> (i32, i32) {
    %c0_i32 = arith.constant 0 : i32
    %c0_i32_0 = arith.constant 0 : i32
    %c0_i32_1 = arith.constant 0 : i32
    return %c0_i32, %c0_i32_0 : i32, i32
  }
  func.func @transform_1(%arg0: i32) -> (i32, i32) {
    %c0_i32 = arith.constant 0 : i32
    %c0_i32_0 = arith.constant 0 : i32
    %c0_i32_1 = arith.constant 0 : i32
    return %c0_i32, %c0_i32_0 : i32, i32
  }
  func.func @transform_2(%arg0: i32) -> (i32, i32) {
    %c0_i32 = arith.constant 0 : i32
    %c0_i32_0 = arith.constant 0 : i32
    %c0_i32_1 = arith.constant 0 : i32
    return %c0_i32, %c0_i32_0 : i32, i32
  }
  func.func @transform_3(%arg0: i32) -> (i32, i32) {
    %c0_i32 = arith.constant 0 : i32
    %c0_i32_0 = arith.constant 0 : i32
    %c0_i32_1 = arith.constant 0 : i32
    return %c0_i32, %c0_i32_0 : i32, i32
  }
  func.func @transform_4(%arg0: i32) -> (i32, i32) {
    %c0_i32 = arith.constant 0 : i32
    %c0_i32_0 = arith.constant 0 : i32
    %c0_i32_1 = arith.constant 0 : i32
    return %c0_i32, %c0_i32_0 : i32, i32
  }
  func.func @transform_5(%arg0: i32) -> (i32, i32) {
    %c0_i32 = arith.constant 0 : i32
    %c0_i32_0 = arith.constant 0 : i32
    %c0_i32_1 = arith.constant 0 : i32
    return %c0_i32, %c0_i32_0 : i32, i32
  }
  func.func @transform_6(%arg0: i32) -> (i32, i32) {
    %c0_i32 = arith.constant 0 : i32
    %c0_i32_0 = arith.constant 0 : i32
    %c0_i32_1 = arith.constant 0 : i32
    return %c0_i32, %c0_i32_0 : i32, i32
  }
  func.func @transform_7(%arg0: i32) -> (i32, i32) {
    %c0_i32 = arith.constant 0 : i32
    %c0_i32_0 = arith.constant 0 : i32
    %c0_i32_1 = arith.constant 0 : i32
    return %c0_i32, %c0_i32_0 : i32, i32
  }
  func.func @transform_8(%arg0: i32) -> (i32, i32) {
    %c0_i32 = arith.constant 0 : i32
    %c0_i32_0 = arith.constant 0 : i32
    %c0_i32_1 = arith.constant 0 : i32
    return %c0_i32, %c0_i32_0 : i32, i32
  }
  func.func @transform_9(%arg0: i32) -> (i32, i32) {
    %c0_i32 = arith.constant 0 : i32
    %c0_i32_0 = arith.constant 0 : i32
    %c0_i32_1 = arith.constant 0 : i32
    return %c0_i32, %c0_i32_0 : i32, i32
  }
  func.func @transform_10(%arg0: i32) -> (i32, i32) {
    %c0_i32 = arith.constant 0 : i32
    %c0_i32_0 = arith.constant 0 : i32
    %c0_i32_1 = arith.constant 0 : i32
    return %c0_i32, %c0_i32_0 : i32, i32
  }
}

</mosaic_0001>

<bundles_post_ra>
// kernel: squeeze.29
= control target key start
LH: loop header
LB: loop body
LE: loop exit
PB: predicated region body
PF: predicated region fallthrough
CT: control target
= control target key end

     0   :  { %s116_s0 = inlined_call_operand.vmem [shape: f32[1,48,128], index: 0, kind: input, shape index: {}]   ;;  %s117_s1 = inlined_call_operand.vmem [shape: f32[8,6,128], index: 1, kind: output, shape index: {}]  }
   0x1   :  { %v2_v0 = vld [vmem:[%s116_s0] sm:$0xff]   ;;  %v37_v1 = vld [vmem:[%s116_s0 + $0x8] sm:$0xff]   ;;  %v40_v2 = vld [vmem:[%s116_s0 + $0x10] sm:$0xff]  }
   0x2   :  { %3 = vst [vmem:[%s117_s1] sm:$0x3f] %v2_v0   ;;  %v43_v3 = vld [vmem:[%s116_s0 + $0x18] sm:$0xff]   ;;  %v46_v4 = vld [vmem:[%s116_s0 + $0x20] sm:$0xff]   ;;  %v49_v5 = vld [vmem:[%s116_s0 + $0x28] sm:$0xff]  }
   0x3   :  { %36 = vst [vmem:[%s117_s1 + $0x2] sm:$0xc0] %v2_v0  }
   0x4   :  { %38 = vst [vmem:[%s117_s1 + $0xa] sm:$0xf] %v37_v1  }
   0x5   :  { %39 = vst [vmem:[%s117_s1 + $0xc] sm:$0xf0] %v37_v1  }
   0x6   :  { %41 = vst [vmem:[%s117_s1 + $0x14] sm:$0x3] %v40_v2  }
   0x7   :  { %42 = vst [vmem:[%s117_s1 + $0x16] sm:$0xfc] %v40_v2  }
   0x8   :  { %44 = vst [vmem:[%s117_s1 + $0x20] sm:$0x3f] %v43_v3  }
   0x9   :  { %45 = vst [vmem:[%s117_s1 + $0x22] sm:$0xc0] %v43_v3  }
   0xa   :  { %47 = vst [vmem:[%s117_s1 + $0x2a] sm:$0xf] %v46_v4  }
   0xb   :  { %48 = vst [vmem:[%s117_s1 + $0x2c] sm:$0xf0] %v46_v4  }
   0xc   :  { %50 = vst [vmem:[%s117_s1 + $0x34] sm:$0x3] %v49_v5  }
   0xd   :  { %51 = vst [vmem:[%s117_s1 + $0x36] sm:$0xfc] %v49_v5  }

</bundles_post_ra>
